<compile_context>
chip_gen: v7x
topology: tpu7x:2x2x1
jax: 0.10.0
libtpu: 0.0.40
codegen_flags: <defaults>
</compile_context>

<pallas_src>
import jax
import jax.numpy as jnp
from jax.experimental import pallas as pl
from jax.experimental.pallas import tpu as pltpu


FEAT_DIM = 79        # 9 embeddings * 8 + 7 numeric columns
FEAT_PAD = 80        # padded feature width (K of the first matmul); == full array dim -> legal block
HEAD_PAD = 128       # lane-replicated width of the collapsed 2-class head (VMEM-resident, tiny)
EMB_DIMS = (13, 4, 5, 3, 3, 3, 4, 13, 5)


def _round_up(x, m):
    return (x + m - 1) // m * m


# ----------------------------- Pallas kernel ------------------------------
def mlp_kernel(x_ref, w1_ref, b1_ref, w2_ref, b2_ref, w3_ref, b3_ref,
               wd_ref, bd_ref, out_ref):
    """One batch tile.

    x_ref : (TILE_B, 80)  BN-folded, zero-padded features (bf16 or f32).
    w*_ref: VMEM-resident weights in [in, out] layout; biases are f32 row vectors.
    wd/bd : 2-class head collapsed to its logit difference (z1 - z0), replicated across
            HEAD_PAD lanes (single lane-dense MXU pass, no XLU reductions anywhere).
    out   : (TILE_B, 2) f32; column 0 = P(class 0), column 1 = P(class 1).
    """
    x = x_ref[...]

    # linear1 (BatchNorm already folded into w1/b1) -> dropout(id) -> relu
    h = jnp.dot(x, w1_ref[...], preferred_element_type=jnp.float32) + b1_ref[...]
    h = jnp.maximum(h, 0.0)
    # linear2 -> dropout(id) -> relu
    h = jnp.dot(h.astype(w2_ref.dtype), w2_ref[...],
                preferred_element_type=jnp.float32) + b2_ref[...]
    h = jnp.maximum(h, 0.0)
    # linear3 -> dropout(id) -> relu
    h = jnp.dot(h.astype(w3_ref.dtype), w3_ref[...],
                preferred_element_type=jnp.float32) + b3_ref[...]
    h = jnp.maximum(h, 0.0)

    # linear4 + double softmax over 2 classes, via the logit difference d = z1 - z0:
    #   softmax(z)[1]          = sigmoid(d)            = q1
    #   softmax(softmax(z))[1] = sigmoid(2*q1 - 1)     = r1,  P(class 0) = 1 - r1
    d = jnp.dot(h.astype(wd_ref.dtype), wd_ref[...],
                preferred_element_type=jnp.float32) + bd_ref[...]        # (TILE_B, HEAD_PAD)

    q1 = pl.reciprocal(1.0 + jnp.exp(-d), approx=True)                   # EUP: exp + approx recip
    r1 = pl.reciprocal(1.0 + jnp.exp(1.0 - 2.0 * q1), approx=True)

    p1 = r1[:, :2]                                                       # lanes replicated -> both equal r1
    lane = jax.lax.broadcasted_iota(jnp.int32, out_ref.shape, 1)         # (TILE_B, 2)
    out_ref[...] = jnp.where(lane == 0, 1.0 - p1, p1)


# ------------------------------ JAX wrapper -------------------------------
def _choose_tile(B, tile_b):
    b16 = _round_up(B, 16)
    if tile_b is None:
        tile_b = 2048            # amortizes per-step cost; DMA sizes at the roofline knee
    tile_b = max(16, _round_up(tile_b, 16))
    tile_b = min(tile_b, b16)
    # v7x has 2 TensorCores: keep >= 2 grid steps when the batch allows it so the
    # "parallel" batch axis actually has work to shard.
    if b16 >= 32:
        tile_b = min(tile_b, _round_up((b16 + 1) // 2, 16))
    b_pad = _round_up(B, tile_b)
    return tile_b, b_pad


def mlp_forward(x_int, params, *, tile_b=None, use_bf16=True):
    """x_int: int32 [B, 16]; cols 0..8 categorical indices, cols 9..15 numeric."""
    B = x_int.shape[0]
    in_dtype = jnp.bfloat16 if use_bf16 else jnp.float32

    # ---- feature building: one fused gather from a single concatenated table ----
    offs, o = [], 0
    for dsz in EMB_DIMS:
        offs.append(o)
        o += dsz
    offsets = jnp.asarray(offs, jnp.int32)                               # [9]
    big_table = jnp.concatenate(params["emb_tables"], axis=0)            # [53, 8]
    idx = x_int[:, :9] + offsets[None, :]                                # [B, 9]
    embed_result = jnp.take(big_table, idx.reshape(-1), axis=0).reshape(B, 72)
    numeric = x_int[:, 9:].astype(jnp.float32)                           # [B, 7]
    feat = jnp.concatenate([embed_result, numeric], axis=1)              # [B, 79]

    # ---- fold BatchNorm1d (eval) into linear1 (kept in f32) ----
    eps = 1e-5
    scale = params["bn_gamma"] * jax.lax.rsqrt(params["bn_var"] + eps)   # [79]
    shift = params["bn_beta"] - params["bn_mean"] * scale                # [79]
    w1f = params["w1"] * scale[:, None]                                  # [79, H]
    b1f = params["b1"] + shift @ params["w1"]                            # [1, H]

    # ---- pad K: 79 -> 80 (zero row/col => identical result) ----
    w1p = jnp.pad(w1f, ((0, FEAT_PAD - FEAT_DIM), (0, 0)))               # [80, H]

    # ---- 2-class head -> lane-replicated logit-difference head ----
    w_diff = params["w4"][:, 1:2] - params["w4"][:, 0:1]                 # [32, 1]
    b_diff = params["b4"][:, 1:2] - params["b4"][:, 0:1]                 # [1, 1]
    wd = jnp.tile(w_diff, (1, HEAD_PAD))                                 # [32, 128]
    bd = jnp.tile(b_diff, (1, HEAD_PAD))                                 # [1, 128]

    # ---- batch tiling ----
    tile_b, b_pad = _choose_tile(B, tile_b)

    feat_p = jnp.pad(feat, ((0, b_pad - B), (0, FEAT_PAD - FEAT_DIM))).astype(in_dtype)
    w1p = w1p.astype(in_dtype)
    w2 = params["w2"].astype(in_dtype)
    w3 = params["w3"].astype(in_dtype)
    wd = wd.astype(in_dtype)
    b1f = b1f.astype(jnp.float32)
    b2 = params["b2"].astype(jnp.float32)
    b3 = params["b3"].astype(jnp.float32)
    bd = bd.astype(jnp.float32)

    def resident(arr):
        # full-array block, same index every grid step -> stays VMEM-resident.
        return pl.BlockSpec(arr.shape, lambda i: (0, 0))

    probs_pad = pl.pallas_call(
        mlp_kernel,
        out_shape=jax.ShapeDtypeStruct((b_pad, 2), jnp.float32),
        grid=(b_pad // tile_b,),
        in_specs=[
            pl.BlockSpec((tile_b, FEAT_PAD), lambda i: (i, 0)),   # pipelined feature tiles
            resident(w1p), resident(b1f),
            resident(w2), resident(b2),
            resident(w3), resident(b3),
            resident(wd), resident(bd),
        ],
        out_specs=pl.BlockSpec((tile_b, 2), lambda i: (i, 0)),
        compiler_params=pltpu.CompilerParams(dimension_semantics=("parallel",)),
    )(feat_p, w1p, b1f, w2, b2, w3, b3, wd, bd)

    probs = probs_pad[:B]
    r = jnp.argmax(probs, axis=1)                                        # matches torch.argmax(dim=1)
    return probs, r


# --------------------------- pure-JAX reference ----------------------------
def mlp_reference(x_int, params):
    embs = [jnp.take(tbl, x_int[:, i], axis=0) for i, tbl in enumerate(params["emb_tables"])]
    feat = jnp.concatenate(embs + [x_int[:, 9:].astype(jnp.float32)], axis=1)
    eps = 1e-5
    xh = (feat - params["bn_mean"]) / jnp.sqrt(params["bn_var"] + eps)
    xh = xh * params["bn_gamma"] + params["bn_beta"]
    h = jnp.maximum(xh @ params["w1"] + params["b1"], 0.0)
    h = jnp.maximum(h @ params["w2"] + params["b2"], 0.0)
    h = jnp.maximum(h @ params["w3"] + params["b3"], 0.0)
    z = h @ params["w4"] + params["b4"]
    p = jax.nn.softmax(z, axis=1)
    p = jax.nn.softmax(p, axis=1)
    return p, jnp.argmax(p, axis=1)


# --------------------------- parameter creation ----------------------------
def init_params(key, hidden_dim, hidden_dim2):
    keys = jax.random.split(key, 32)
    ki = iter(keys)

    def lin(kin, fan_in, fan_out):
        kw, kb = jax.random.split(kin)
        bound = 1.0 / jnp.sqrt(fan_in)
        w = jax.random.uniform(kw, (fan_in, fan_out), jnp.float32, -bound, bound)
        b = jax.random.uniform(kb, (1, fan_out), jnp.float32, -bound, bound)
        return w, b

    params = {}
    params["emb_tables"] = [
        jax.random.normal(next(ki), (d, 8), jnp.float32) for d in EMB_DIMS
    ]
    params["bn_gamma"] = jnp.ones((79,), jnp.float32) + 0.1 * jax.random.normal(next(ki), (79,))
    params["bn_beta"] = 0.1 * jax.random.normal(next(ki), (79,))
    params["bn_mean"] = 0.5 * jax.random.normal(next(ki), (79,))
    params["bn_var"] = jnp.abs(jax.random.normal(next(ki), (79,))) + 0.5
    params["w1"], params["b1"] = lin(next(ki), 79, hidden_dim)
    params["w2"], params["b2"] = lin(next(ki), hidden_dim, hidden_dim2)
    params["w3"], params["b3"] = lin(next(ki), hidden_dim2, 32)
    params["w4"], params["b4"] = lin(next(ki), 32, 2)
    return params


def _make_input(kx1, kx2, B):
    emb_dims = jnp.asarray(EMB_DIMS, jnp.int32)
    cat_cols = jax.random.randint(kx1, (B, 9), 0, 1000, jnp.int32) % emb_dims[None, :]
    num_cols = jax.random.randint(kx2, (B, 7), 0, 10, jnp.int32)
    return jnp.concatenate([cat_cols, num_cols], axis=1)                 # [B, 16] int32


if __name__ == "__main__":
    # config: hidden_dim=64, hidden_dim2=32, dropout=0.1 (dropout is identity in eval mode)
    # TODO(synk): training branch (y is not None) with CrossEntropyLoss is not implemented;
    #             this kernel reproduces the inference (y=None) path only.
    HIDDEN_DIM, HIDDEN_DIM2 = 64, 32
    B = 8

    key = jax.random.PRNGKey(0)
    kp, kx1, kx2, kx3, kx4 = jax.random.split(key, 5)
    params = init_params(kp, HIDDEN_DIM, HIDDEN_DIM2)

    fwd = jax.jit(mlp_forward)

    # --- small batch (single grid step) ---
    x = _make_input(kx1, kx2, B)                                         # [8, 16] int32
    probs, r = fwd(x, params)
    jax.block_until_ready((probs, r))
    probs_ref, _ = mlp_reference(x, params)

    assert probs.shape == (B, 2) and r.shape == (B,)
    assert bool(jnp.all(jnp.isfinite(probs)))
    assert bool(jnp.allclose(jnp.sum(probs, axis=1), 1.0, atol=1e-3))
    # loose tolerance: bf16 input/weight streams + approx reciprocals (f32 accumulation kept)
    assert bool(jnp.allclose(probs, probs_ref, atol=3e-2))

    # --- slightly larger batch: exercises the multi-tile (grid >= 2) + padded-row path ---
    B2 = 40
    x2 = _make_input(kx3, kx4, B2)
    probs2, r2 = fwd(x2, params)
    jax.block_until_ready((probs2, r2))
    probs2_ref, _ = mlp_reference(x2, params)
    assert probs2.shape == (B2, 2) and r2.shape == (B2,)
    assert bool(jnp.allclose(jnp.sum(probs2, axis=1), 1.0, atol=1e-3))
    assert bool(jnp.allclose(probs2, probs2_ref, atol=3e-2))

    print("KERNEL_OK")
</pallas_src>

<mosaic_0001>
module attributes {stable_mosaic.version = 11 : i64} {
  func.func @mlp_kernel(%arg0: i32, %arg1: memref<16x80xbf16, #tpu.memory_space<vmem>>, %arg2: memref<80x64xbf16, #tpu.memory_space<vmem>>, %arg3: memref<1x64xf32, #tpu.memory_space<vmem>>, %arg4: memref<64x32xbf16, #tpu.memory_space<vmem>>, %arg5: memref<1x32xf32, #tpu.memory_space<vmem>>, %arg6: memref<32x32xbf16, #tpu.memory_space<vmem>>, %arg7: memref<1x32xf32, #tpu.memory_space<vmem>>, %arg8: memref<32x128xbf16, #tpu.memory_space<vmem>>, %arg9: memref<1x128xf32, #tpu.memory_space<vmem>>, %arg10: memref<16x2xf32, #tpu.memory_space<vmem>>) attributes {dimension_semantics = [#tpu.dimension_semantics<parallel>], iteration_bounds = array<i64: 1>, scalar_prefetch = 0 : i64, scratch_operands = 0 : i64, tpu.core_type = #tpu.core_type<tc>, window_params = [{transform_indices = @transform_0, window_bounds = array<i64: 16, 80>}, {pipeline_mode = #tpu.pipeline_mode<synchronous>, transform_indices = @transform_1, window_bounds = array<i64: 80, 64>}, {pipeline_mode = #tpu.pipeline_mode<synchronous>, transform_indices = @transform_2, window_bounds = array<i64: 1, 64>}, {pipeline_mode = #tpu.pipeline_mode<synchronous>, transform_indices = @transform_3, window_bounds = array<i64: 64, 32>}, {pipeline_mode = #tpu.pipeline_mode<synchronous>, transform_indices = @transform_4, window_bounds = array<i64: 1, 32>}, {pipeline_mode = #tpu.pipeline_mode<synchronous>, transform_indices = @transform_5, window_bounds = array<i64: 32, 32>}, {pipeline_mode = #tpu.pipeline_mode<synchronous>, transform_indices = @transform_6, window_bounds = array<i64: 1, 32>}, {pipeline_mode = #tpu.pipeline_mode<synchronous>, transform_indices = @transform_7, window_bounds = array<i64: 32, 128>}, {pipeline_mode = #tpu.pipeline_mode<synchronous>, transform_indices = @transform_8, window_bounds = array<i64: 1, 128>}, {transform_indices = @transform_9, window_bounds = array<i64: 16, 2>}]} {
    %c0 = arith.constant 0 : index
    %c0_0 = arith.constant 0 : index
    %0 = vector.load %arg1[%c0, %c0_0] : memref<16x80xbf16, #tpu.memory_space<vmem>>, vector<16x80xbf16>
    %c0_1 = arith.constant 0 : index
    %c0_2 = arith.constant 0 : index
    %1 = vector.load %arg2[%c0_1, %c0_2] : memref<80x64xbf16, #tpu.memory_space<vmem>>, vector<80x64xbf16>
    %cst = arith.constant dense<0.000000e+00> : vector<16x64xf32>
    %2 = tpu.matmul %0, %1, %cst {dimension_numbers = #tpu.dot_dimension_numbers<[1], [0], [0], [1], [0, 0, 1, 1], [], []>} : vector<16x80xbf16>, vector<80x64xbf16>, vector<16x64xf32> -> vector<16x64xf32>
    %c0_3 = arith.constant 0 : index
    %c0_4 = arith.constant 0 : index
    %3 = vector.load %arg3[%c0_3, %c0_4] : memref<1x64xf32, #tpu.memory_space<vmem>>, vector<1x64xf32>
    %4 = vector.broadcast %3 : vector<1x64xf32> to vector<16x64xf32>
    %5 = arith.addf %2, %4 : vector<16x64xf32>
    %cst_5 = arith.constant 0.000000e+00 : f32
    %6 = vector.broadcast %cst_5 : f32 to vector<16x64xf32>
    %7 = arith.maximumf %5, %6 : vector<16x64xf32>
    %8 = arith.truncf %7 : vector<16x64xf32> to vector<16x64xbf16>
    %c0_6 = arith.constant 0 : index
    %c0_7 = arith.constant 0 : index
    %9 = vector.load %arg4[%c0_6, %c0_7] : memref<64x32xbf16, #tpu.memory_space<vmem>>, vector<64x32xbf16>
    %cst_8 = arith.constant dense<0.000000e+00> : vector<16x32xf32>
    %10 = tpu.matmul %8, %9, %cst_8 {dimension_numbers = #tpu.dot_dimension_numbers<[1], [0], [0], [1], [0, 0, 1, 1], [], []>} : vector<16x64xbf16>, vector<64x32xbf16>, vector<16x32xf32> -> vector<16x32xf32>
    %c0_9 = arith.constant 0 : index
    %c0_10 = arith.constant 0 : index
    %11 = vector.load %arg5[%c0_9, %c0_10] : memref<1x32xf32, #tpu.memory_space<vmem>>, vector<1x32xf32>
    %12 = vector.broadcast %11 : vector<1x32xf32> to vector<16x32xf32>
    %13 = arith.addf %10, %12 : vector<16x32xf32>
    %cst_11 = arith.constant 0.000000e+00 : f32
    %14 = vector.broadcast %cst_11 : f32 to vector<16x32xf32>
    %15 = arith.maximumf %13, %14 : vector<16x32xf32>
    %16 = arith.truncf %15 : vector<16x32xf32> to vector<16x32xbf16>
    %c0_12 = arith.constant 0 : index
    %c0_13 = arith.constant 0 : index
    %17 = vector.load %arg6[%c0_12, %c0_13] : memref<32x32xbf16, #tpu.memory_space<vmem>>, vector<32x32xbf16>
    %cst_14 = arith.constant dense<0.000000e+00> : vector<16x32xf32>
    %18 = tpu.matmul %16, %17, %cst_14 {dimension_numbers = #tpu.dot_dimension_numbers<[1], [0], [0], [1], [0, 0, 1, 1], [], []>} : vector<16x32xbf16>, vector<32x32xbf16>, vector<16x32xf32> -> vector<16x32xf32>
    %c0_15 = arith.constant 0 : index
    %c0_16 = arith.constant 0 : index
    %19 = vector.load %arg7[%c0_15, %c0_16] : memref<1x32xf32, #tpu.memory_space<vmem>>, vector<1x32xf32>
    %20 = vector.broadcast %19 : vector<1x32xf32> to vector<16x32xf32>
    %21 = arith.addf %18, %20 : vector<16x32xf32>
    %cst_17 = arith.constant 0.000000e+00 : f32
    %22 = vector.broadcast %cst_17 : f32 to vector<16x32xf32>
    %23 = arith.maximumf %21, %22 : vector<16x32xf32>
    %24 = arith.truncf %23 : vector<16x32xf32> to vector<16x32xbf16>
    %c0_18 = arith.constant 0 : index
    %c0_19 = arith.constant 0 : index
    %25 = vector.load %arg8[%c0_18, %c0_19] : memref<32x128xbf16, #tpu.memory_space<vmem>>, vector<32x128xbf16>
    %cst_20 = arith.constant dense<0.000000e+00> : vector<16x128xf32>
    %26 = tpu.matmul %24, %25, %cst_20 {dimension_numbers = #tpu.dot_dimension_numbers<[1], [0], [0], [1], [0, 0, 1, 1], [], []>} : vector<16x32xbf16>, vector<32x128xbf16>, vector<16x128xf32> -> vector<16x128xf32>
    %c0_21 = arith.constant 0 : index
    %c0_22 = arith.constant 0 : index
    %27 = vector.load %arg9[%c0_21, %c0_22] : memref<1x128xf32, #tpu.memory_space<vmem>>, vector<1x128xf32>
    %28 = vector.broadcast %27 : vector<1x128xf32> to vector<16x128xf32>
    %29 = arith.addf %26, %28 : vector<16x128xf32>
    %cst_23 = arith.constant 0.000000e+00 : f32
    %30 = vector.broadcast %cst_23 : f32 to vector<16x128xf32>
    %31 = arith.subf %30, %29 : vector<16x128xf32>
    %32 = math.exp %31 : vector<16x128xf32>
    %cst_24 = arith.constant 1.000000e+00 : f32
    %33 = vector.broadcast %cst_24 : f32 to vector<16x128xf32>
    %34 = arith.addf %33, %32 : vector<16x128xf32>
    %35 = tpu.reciprocal %34 {approx = true} : vector<16x128xf32> -> vector<16x128xf32>
    %cst_25 = arith.constant 2.000000e+00 : f32
    %36 = vector.broadcast %cst_25 : f32 to vector<16x128xf32>
    %37 = arith.mulf %36, %35 : vector<16x128xf32>
    %cst_26 = arith.constant 1.000000e+00 : f32
    %38 = vector.broadcast %cst_26 : f32 to vector<16x128xf32>
    %39 = arith.subf %38, %37 : vector<16x128xf32>
    %40 = math.exp %39 : vector<16x128xf32>
    %cst_27 = arith.constant 1.000000e+00 : f32
    %41 = vector.broadcast %cst_27 : f32 to vector<16x128xf32>
    %42 = arith.addf %41, %40 : vector<16x128xf32>
    %43 = tpu.reciprocal %42 {approx = true} : vector<16x128xf32> -> vector<16x128xf32>
    %44 = vector.extract_strided_slice %43 {offsets = [0, 0], sizes = [16, 2], strides = [1, 1]} : vector<16x128xf32> to vector<16x2xf32>
    %45 = tpu.iota {dimensions = array<i32: 1>} : vector<16x2xi32>
    %c0_i32 = arith.constant 0 : i32
    %46 = vector.broadcast %c0_i32 : i32 to vector<16x2xi32>
    %47 = arith.cmpi eq, %45, %46 : vector<16x2xi32>
    %cst_28 = arith.constant 1.000000e+00 : f32
    %48 = vector.broadcast %cst_28 : f32 to vector<16x2xf32>
    %49 = arith.subf %48, %44 : vector<16x2xf32>
    %50 = arith.select %47, %49, %44 : vector<16x2xi1>, vector<16x2xf32>
    %c0_29 = arith.constant 0 : index
    %c0_30 = arith.constant 0 : index
    %51 = vector.load %arg10[%c0_29, %c0_30] : memref<16x2xf32, #tpu.memory_space<vmem>>, vector<16x2xf32>
    tpu.vector_store %arg10[%c0_29, %c0_30], %50 {strides = array<i32>} : memref<16x2xf32, #tpu.memory_space<vmem>>, vector<16x2xf32>,
    return
  }
  func.func @transform_0(%arg0: i32) -> (i32, i32) {
    %c0_i32 = arith.constant 0 : i32
    %c0_i32_0 = arith.constant 0 : i32
    return %arg0, %c0_i32 : i32, i32
  }
  func.func @transform_1(%arg0: i32) -> (i32, i32) {
    %c0_i32 = arith.constant 0 : i32
    %c0_i32_0 = arith.constant 0 : i32
    %c0_i32_1 = arith.constant 0 : i32
    return %c0_i32, %c0_i32_0 : i32, i32
  }
  func.func @transform_2(%arg0: i32) -> (i32, i32) {
    %c0_i32 = arith.constant 0 : i32
    %c0_i32_0 = arith.constant 0 : i32
    %c0_i32_1 = arith.constant 0 : i32
    return %c0_i32, %c0_i32_0 : i32, i32
  }
  func.func @transform_3(%arg0: i32) -> (i32, i32) {
    %c0_i32 = arith.constant 0 : i32
    %c0_i32_0 = arith.constant 0 : i32
    %c0_i32_1 = arith.constant 0 : i32
    return %c0_i32, %c0_i32_0 : i32, i32
  }
  func.func @transform_4(%arg0: i32) -> (i32, i32) {
    %c0_i32 = arith.constant 0 : i32
    %c0_i32_0 = arith.constant 0 : i32
    %c0_i32_1 = arith.constant 0 : i32
    return %c0_i32, %c0_i32_0 : i32, i32
  }
  func.func @transform_5(%arg0: i32) -> (i32, i32) {
    %c0_i32 = arith.constant 0 : i32
    %c0_i32_0 = arith.constant 0 : i32
    %c0_i32_1 = arith.constant 0 : i32
    return %c0_i32, %c0_i32_0 : i32, i32
  }
  func.func @transform_6(%arg0: i32) -> (i32, i32) {
    %c0_i32 = arith.constant 0 : i32
    %c0_i32_0 = arith.constant 0 : i32
    %c0_i32_1 = arith.constant 0 : i32
    return %c0_i32, %c0_i32_0 : i32, i32
  }
  func.func @transform_7(%arg0: i32) -> (i32, i32) {
    %c0_i32 = arith.constant 0 : i32
    %c0_i32_0 = arith.constant 0 : i32
    %c0_i32_1 = arith.constant 0 : i32
    return %c0_i32, %c0_i32_0 : i32, i32
  }
  func.func @transform_8(%arg0: i32) -> (i32, i32) {
    %c0_i32 = arith.constant 0 : i32
    %c0_i32_0 = arith.constant 0 : i32
    %c0_i32_1 = arith.constant 0 : i32
    return %c0_i32, %c0_i32_0 : i32, i32
  }
  func.func @transform_9(%arg0: i32) -> (i32, i32) {
    %c0_i32 = arith.constant 0 : i32
    %c0_i32_0 = arith.constant 0 : i32
    return %arg0, %c0_i32 : i32, i32
  }
}

</mosaic_0001>

<bundles_post_ra>
// kernel: mlp_forward.1
= control target key start
LH: loop header
LB: loop body
LE: loop exit
PB: predicated region body
PF: predicated region fallthrough
CT: control target
= control target key end

     0   :  { %v509_v0 = vmov 0.0   ;;  %vm510_vm0 = vmmov 0   ;;  %vm87_vm1 = vcmask 654336   ;;  %vm174_vm2 = vcmask 523264   ;;  %s644_s1 = inlined_call_operand.vmem [shape: bf16[80,64], index: 1, kind: input, shape index: {}]   ;;  %s645_s3 = inlined_call_operand.vmem [shape: bf16[64,32], index: 3, kind: input, shape index: {}]   ;;  %s646_s0 = inlined_call_operand.vmem [shape: bf16[16,80], index: 0, kind: input, shape index: {}]   ;;  %s647_s2 = inlined_call_operand.vmem [shape: f32[1,64], index: 2, kind: input, shape index: {}]   ;;  %s648_s5 = inlined_call_operand.vmem [shape: bf16[32,32], index: 5, kind: input, shape index: {}]   ;;  %s649_s4 = inlined_call_operand.vmem [shape: f32[1,32], index: 4, kind: input, shape index: {}]   ;;  %s650_s7 = inlined_call_operand.vmem [shape: bf16[32,128], index: 7, kind: input, shape index: {}]   ;;  %s651_s6 = inlined_call_operand.vmem [shape: f32[1,32], index: 6, kind: input, shape index: {}]   ;;  %s652_s8 = inlined_call_operand.vmem [shape: f32[1,128], index: 8, kind: input, shape index: {}]   ;;  %s653_s9 = inlined_call_operand.vmem [shape: f32[16,2], index: 9, kind: output, shape index: {}]  }
   0x1   :  { %435 = vmatprep.subr.bf16.mxu0 %v509_v0  ;;  %v479_v1 = vld [vmem:[%s644_s1] sm:$0xff]   ;;  %445 = vmatprep.mubr.msk.bf16.mxu0 %vm510_vm0, %v509_v0  ;;  %v480_v2 = vld [vmem:[%s644_s1 + $0x8] sm:$0xff]   ;;  %v481_v3 = vld [vmem:[%s644_s1 + $0x10] sm:$0xff]   ;;  %vm245_vm3 = vcmask 261120   ;;  %vm389_vm5 = vcmask 15360  }
   0x2   :  { %449 = vmatprep.subr.bf16.mxu1 %v509_v0  ;;  %457 = vmatprep.mubr.msk.bf16.mxu1 %vm510_vm0, %v509_v0  ;;  %v485_v4 = vld [vmem:[%s645_s3] sm:$0xff]   ;;  %v486_v5 = vld [vmem:[%s645_s3 + $0x8] sm:$0xff]   ;;  %v482_v6 = vld [vmem:[%s644_s1 + $0x18] sm:$0xff]  }
   0x3   :  { %436 = vmatpush3.bf16.msra.mxu0 %v479_v1  ;;  %450 = vmatpush3.bf16.msra.mxu1 %v485_v4  ;;  %v483_v7 = vld [vmem:[%s644_s1 + $0x20] sm:$0xff]   ;;  %v487_v9 = vld [vmem:[%s645_s3 + $0x10] sm:$0xff]   ;;  %v488_v10 = vld [vmem:[%s645_s3 + $0x18] sm:$0xff]  }
   0x4   :  { %437 = vmatprep.subr.bf16.mxu0 %v509_v0  ;;  %451 = vmatprep.subr.bf16.mxu1 %v509_v0  ;;  %v484_v8 = vld [vmem:[%s646_s0] sm:$0xff]   ;;  %v490_v22 = vld [vmem:[%s648_s5 + $0x8] sm:$0xff]  }
   0x5   :  { %v396_v11 = vld [vmem:[%s647_s2] ss:$0 sm:$0xff]  ;;  %v492_v34 = vld [vmem:[%s650_s7 + $0x8] sm:$0xff]  }
   0x6   :  { %v489_v21 = vld [vmem:[%s648_s5] sm:$0xff]  }
   0x7   :  { %438 = vmatpush3.bf16.msra.mxu0 %v480_v2  ;;  %452 = vmatpush3.bf16.msra.mxu1 %v486_v5  ;;  %v404_v23 = vld [vmem:[%s649_s4] ss:$0 sm:$0xff] }
   0x8   :  { %439 = vmatprep.subr.bf16.mxu0 %v509_v0  ;;  %453 = vmatprep.subr.bf16.mxu1 %v509_v0  ;;  %v491_v33 = vld [vmem:[%s650_s7] sm:$0xff]  }
   0x9   :  { %v410_v35 = vld [vmem:[%s651_s6] ss:$0 sm:$0xff] }
   0xa   :  { %v414_v45 = vld [vmem:[%s652_s8] ss:$0 sm:$0xff] }
   0xb   :  { %440 = vmatpush3.bf16.msra.mxu0 %v481_v3  ;;  %454 = vmatpush3.bf16.msra.mxu1 %v487_v9 }
   0xc   :  { %441 = vmatprep.subr.bf16.mxu0 %v509_v0  ;;  %455 = vmatprep.subr.bf16.mxu1 %v509_v0 }
   0xf   :  { %442 = vmatpush3.bf16.msra.mxu0 %v482_v6  ;;  %456 = vmatpush3.bf16.msra.mxu1 %v488_v10 }
  0x10   :  { %443 = vmatprep.subr.bf16.mxu0 %v509_v0  ;;  %461 = vmatprep.subr.bf16.mxu1 %v509_v0 }
  0x13   :  { %444 = vmatpush3.bf16.msra.mxu0 %v483_v7 }
  0x14   :  { %469 = vmatprep.subr.bf16.mxu0 %v509_v0 }
  0x16   :  { %446 = vmatmul.mubr.msk.bf16.vlgmr.msra.gmra.mrb[0].mxu0 %vm87_vm1, %v484_v8  ;;  %v382_v8 = vlaneseq }
  0x17   :  { %473 = vmatprep.mubr.msk.bf16.mxu0 %vm510_vm0, %v509_v0  ;;  %470 = vmatpush3.bf16.msra.mxu0 %v491_v33 }
  0x18   :  { %471 = vmatprep.subr.bf16.mxu0 %v509_v0  ;;  %v383_v9 = vand.u32 127, %v382_v8 }
  0x1a   :  { %vm384_vm4 = vcmp.eq.s32.totalorder %v383_v9, 0 }
  0x1b   :  { %472 = vmatpush3.bf16.msra.mxu0 %v492_v34 }
  0xe9   :  { %v125_v12 = vpop.f32.mrb[0].mxu0 }
  0xea   :  { %v126_v13 = vadd.f32 %v396_v11, %v125_v12  ;;  %v447_v14 = vpop.f32.mrb[1].mxu0 }
  0xeb   :  { %v128_v15 = vpop.f32.mrb[2].mxu0 }
  0xec   :  { %v129_v16 = vadd.f32 %v396_v11, %v128_v15  ;;  %v448_v17 = vpop.f32.mrb[3].mxu0  ;;  %v132_v18 = vmax.f32 %v126_v13, 0.0 }
  0xee   :  { %v133_v19 = vmax.f32 %v129_v16, 0.0 }
  0xf0   :  { %v134_v20 = vpack.c.bf16 %v133_v19, %v132_v18 }
  0xf2   :  { %458 = vmatmul.mubr.msk.bf16.vlgmr.msra.gmra.mrb[0].mxu1 %vm174_vm2, %v134_v20 }
  0xf3   :  { %465 = vmatprep.mubr.msk.bf16.mxu1 %vm510_vm0, %v509_v0  ;;  %462 = vmatpush3.bf16.msra.mxu1 %v489_v21 }
  0xf4   :  { %463 = vmatprep.subr.bf16.mxu1 %v509_v0 }
  0xf7   :  { %464 = vmatpush3.bf16.msra.mxu1 %v490_v22 }
 0x1c5   :  { %v212_v24 = vpop.f32.mrb[0].mxu1 }
 0x1c6   :  { %v213_v25 = vadd.f32 %v404_v23, %v212_v24  ;;  %v459_v26 = vpop.f32.mrb[1].mxu1 }
 0x1c7   :  { %v215_v27 = vpop.f32.mrb[2].mxu1 }
 0x1c8   :  { %v216_v28 = vadd.f32 %v404_v23, %v215_v27  ;;  %v460_v29 = vpop.f32.mrb[3].mxu1  ;;  %v219_v30 = vmax.f32 %v213_v25, 0.0 }
 0x1ca   :  { %v220_v31 = vmax.f32 %v216_v28, 0.0 }
 0x1cc   :  { %v221_v32 = vpack.c.bf16 %v220_v31, %v219_v30 }
 0x1ce   :  { %466 = vmatmul.mubr.msk.bf16.vlgmr.msra.gmra.mrb[4].mxu1 %vm245_vm3, %v221_v32 }
 0x2a1   :  { %v283_v36 = vpop.f32.mrb[4].mxu1 }
 0x2a2   :  { %v284_v37 = vadd.f32 %v410_v35, %v283_v36  ;;  %v467_v38 = vpop.f32.mrb[5].mxu1 }
 0x2a3   :  { %v286_v39 = vpop.f32.mrb[6].mxu1 }
 0x2a4   :  { %v287_v40 = vadd.f32 %v410_v35, %v286_v39  ;;  %v468_v41 = vpop.f32.mrb[7].mxu1  ;;  %v290_v42 = vmax.f32 %v284_v37, 0.0 }
 0x2a6   :  { %v291_v43 = vmax.f32 %v287_v40, 0.0 }
 0x2a8   :  { %v292_v44 = vpack.c.bf16 %v291_v43, %v290_v42 }
 0x2aa   :  { %474 = vmatmul.mubr.msk.bf16.vlgmr.msra.gmra.mrb[4].mxu0 %vm245_vm3, %v292_v44 }
 0x37d   :  { %v353_v46 = vpop.f32.mrb[4].mxu0 }
 0x37e   :  { %v354_v47 = vadd.f32 %v414_v45, %v353_v46  ;;  %v475_v48 = vpop.f32.mrb[5].mxu0 }
 0x37f   :  { %v356_v49 = vpop.f32.mrb[6].mxu0 }
 0x380   :  { %v360_v50 = vsub.f32 0.0, %v354_v47  ;;  %v357_v51 = vadd.f32 %v414_v45, %v356_v49  ;;  %v476_v52 = vpop.f32.mrb[7].mxu0 }
 0x382   :  { %v362_v53 = vmul.f32 1.442695, %v360_v50  ;;  %v361_v54 = vsub.f32 0.0, %v357_v51 }
 0x384   :  { %493 = vpow2.f32 %v362_v53  ;;  %v364_v55 = vmul.f32 1.442695, %v361_v54 }
 0x386   :  { %495 = vpow2.f32 %v364_v55 }
 0x38e   :  { %v494_v56 = vpop.eup %493 }
 0x38f   :  { %v366_v57 = vadd.f32 1.0, %v494_v56 }
 0x390   :  { %v496_v58 = vpop.eup %495 }
 0x391   :  { %497 = vrcp.f32 %v366_v57  ;;  %v367_v59 = vadd.f32 1.0, %v496_v58 }
 0x393   :  { %499 = vrcp.f32 %v367_v59 }
 0x39b   :  { %v498_v60 = vpop.eup %497 }
 0x39c   :  { %v370_v61 = vmul.f32 2.0, %v498_v60 }
 0x39d   :  { %v500_v62 = vpop.eup %499 }
 0x39e   :  { %v372_v63 = vsub.f32 1.0, %v370_v61  ;;  %v371_v0 = vmul.f32 2.0, %v500_v62 }
 0x3a0   :  { %v374_v1 = vmul.f32 1.442695, %v372_v63  ;;  %v373_v2 = vsub.f32 1.0, %v371_v0 }
 0x3a2   :  { %501 = vpow2.f32 %v374_v1  ;;  %v376_v3 = vmul.f32 1.442695, %v373_v2 }
 0x3a4   :  { %503 = vpow2.f32 %v376_v3 }
 0x3ac   :  { %v502_v4 = vpop.eup %501 }
 0x3ad   :  { %v378_v5 = vadd.f32 1.0, %v502_v4 }
 0x3ae   :  { %v504_v6 = vpop.eup %503 }
 0x3af   :  { %505 = vrcp.f32 %v378_v5  ;;  %v379_v7 = vadd.f32 1.0, %v504_v6 }
 0x3b1   :  { %507 = vrcp.f32 %v379_v7 }
 0x3b9   :  { %v506_v10 = vpop.eup %505 }
 0x3ba   :  { %v385_v11 = vsub.f32 1.0, %v506_v10 }
 0x3bb   :  { %v508_v12 = vpop.eup %507 }
 0x3bc   :  { %v387_v13 = vsel %vm384_vm4, %v385_v11, %v506_v10  ;;  %v386_v14 = vsub.f32 1.0, %v508_v12 }
 0x3bd   :  { %390 = vst.msk [vmem:[%s653_s9] sm:$0xff] %vm389_vm5, %v387_v13 }
 0x3be   :  { %v388_v15 = vsel %vm384_vm4, %v386_v14, %v508_v12 }
 0x3bf   :  { %391 = vst.msk [vmem:[%s653_s9 + $0x8] sm:$0xff] %vm389_vm5, %v388_v15 }

</bundles_post_ra>
